<compile_context>
chip_gen: v6e
topology: v6e:2x2x1
jax: 0.10.0
libtpu: 0.0.40
codegen_flags: <defaults>
</compile_context>

<pallas_src>
import functools

import jax
import jax.numpy as jnp
from jax.experimental import pallas as pl
from jax.experimental.pallas import tpu as pltpu

MARGIN = 5.0
PAIRWISE_EPS = 1e-6          # F.pairwise_distance default eps (added to the difference)
NUM_SPLITS = 2               # leading "parallel" axis -> both TCs on v7x, no-op on 1-TC chips
_TILE_BUDGET_BYTES = 16 * 1024 * 1024   # budget for double-buffered x1 + x2 tiles


def _round_up(x, m):
    return (x + m - 1) // m * m


def _contrastive_loss_kernel(x1_ref, x2_ref, y_ref, out_ref, acc_ref, *,
                             batch, rows_per_split, tile_rows, margin, eps):
    t = pl.program_id(1)               # tile index within this split (reduction axis)
    nt = pl.num_programs(1)

    @pl.when(t == 0)
    def _init():
        acc_ref[...] = jnp.zeros_like(acc_ref)

    x1 = x1_ref[...].astype(jnp.float32)          # (TB, D)
    x2 = x2_ref[...].astype(jnp.float32)          # (TB, D)
    y = y_ref[...].astype(jnp.float32)            # (TB, 1)

    # pairwise_distance: eps is added to the element-wise difference before the norm.
    diff = x1 - x2 + eps
    sq_dist = jnp.sum(diff * diff, axis=-1, keepdims=True)   # (TB, 1) == d^2
    dist = jnp.sqrt(sq_dist)                                  # (TB, 1) == d
    hinge = jnp.maximum(margin - dist, 0.0)
    per_sample = y * sq_dist + (1.0 - y) * (hinge * hinge)   # (TB, 1)

    # Mask padded rows so they don't pollute the batch mean.
    row0 = pl.program_id(0) * rows_per_split + t * tile_rows
    row_idx = row0 + jax.lax.broadcasted_iota(jnp.int32, per_sample.shape, 0)
    valid = (row_idx < batch).astype(jnp.float32)

    acc_ref[...] += jnp.sum(per_sample * valid).reshape(1, 1)

    @pl.when(t == nt - 1)
    def _finalize():
        # Write this split's partial sum into element (0, 0) of its (8,128) output
        # block; everything else is zero so the wrapper can just sum the output.
        r = jax.lax.broadcasted_iota(jnp.int32, out_ref.shape, 0)
        c = jax.lax.broadcasted_iota(jnp.int32, out_ref.shape, 1)
        acc = acc_ref[...]                                    # (1, 1)
        out_ref[...] = jnp.where((r == 0) & (c == 0), acc, jnp.zeros_like(acc))


def contrastive_loss(out_1, out_2, y, margin=MARGIN, eps=PAIRWISE_EPS):
    """out_1, out_2: (B, D); y: (B,). Returns scalar float32 loss."""
    B, D = out_1.shape
    itemsize = jnp.dtype(out_1.dtype).itemsize

    # Biggest batch tile whose double-buffered x1+x2 working set fits the budget,
    # multiple of 8 (f32 sublane tiling), capped at 1024 rows, never larger than needed.
    tb = _TILE_BUDGET_BYTES // (4 * D * itemsize)     # 2 inputs x 2 pipeline buffers
    tb = max(8, min(1024, (tb // 8) * 8))
    rows_needed = -(-B // NUM_SPLITS)                 # ceil(B / NUM_SPLITS)
    tb = min(tb, _round_up(rows_needed, 8))

    tiles_per_split = -(-rows_needed // tb)
    rows_per_split = tiles_per_split * tb
    b_pad = NUM_SPLITS * rows_per_split

    y2d = y.reshape(B, 1)
    if b_pad != B:
        pad = b_pad - B
        out_1 = jnp.pad(out_1, ((0, pad), (0, 0)))
        out_2 = jnp.pad(out_2, ((0, pad), (0, 0)))
        y2d = jnp.pad(y2d, ((0, pad), (0, 0)))

    kernel = functools.partial(
        _contrastive_loss_kernel,
        batch=B, rows_per_split=rows_per_split, tile_rows=tb,
        margin=float(margin), eps=float(eps))

    partials = pl.pallas_call(
        kernel,
        out_shape=jax.ShapeDtypeStruct((NUM_SPLITS * 8, 128), jnp.float32),
        grid_spec=pltpu.PrefetchScalarGridSpec(
            num_scalar_prefetch=0,
            grid=(NUM_SPLITS, tiles_per_split),
            in_specs=[
                pl.BlockSpec((tb, D), lambda c, t: (c * tiles_per_split + t, 0)),
                pl.BlockSpec((tb, D), lambda c, t: (c * tiles_per_split + t, 0)),
                pl.BlockSpec((tb, 1), lambda c, t: (c * tiles_per_split + t, 0)),
            ],
            out_specs=pl.BlockSpec((8, 128), lambda c, t: (c, 0)),
            scratch_shapes=[pltpu.VMEM((1, 1), jnp.float32)],
        ),
        compiler_params=pltpu.CompilerParams(
            dimension_semantics=("parallel", "arbitrary"),
            vmem_limit_bytes=32 * 1024 * 1024,
        ),
    )(out_1, out_2, y2d)

    # Partial sums (one non-zero element per split) -> mean over the true batch.
    return jnp.sum(partials) / jnp.float32(B)


def _reference(out_1, out_2, y, margin=MARGIN):
    diff = out_1.astype(jnp.float32) - out_2.astype(jnp.float32) + PAIRWISE_EPS
    d = jnp.sqrt(jnp.sum(diff * diff, axis=-1))
    return jnp.mean(y * d * d + (1.0 - y) * jnp.square(jnp.maximum(margin - d, 0.0)))


if __name__ == "__main__":
    key = jax.random.PRNGKey(0)

    # Case 1: tile-aligned small batch.
    k1, k2, k3, key = jax.random.split(key, 4)
    B, D = 8, 32
    a1 = jax.random.normal(k1, (B, D), dtype=jnp.float32)
    a2 = jax.random.normal(k2, (B, D), dtype=jnp.float32)
    Y = jax.random.bernoulli(k3, 0.5, (B,)).astype(jnp.float32)
    loss = contrastive_loss(a1, a2, Y)
    jax.block_until_ready(loss)
    ref = _reference(a1, a2, Y)
    assert jnp.allclose(loss, ref, rtol=1e-5, atol=1e-5), (loss, ref)

    # Case 2: batch not a multiple of the tile / split size (exercises masking).
    k1, k2, k3, key = jax.random.split(key, 4)
    B2, D2 = 13, 32
    b1 = jax.random.normal(k1, (B2, D2), dtype=jnp.float32)
    b2 = jax.random.normal(k2, (B2, D2), dtype=jnp.float32)
    Y2 = jax.random.bernoulli(k3, 0.5, (B2,)).astype(jnp.float32)
    loss2 = contrastive_loss(b1, b2, Y2)
    jax.block_until_ready(loss2)
    ref2 = _reference(b1, b2, Y2)
    assert jnp.allclose(loss2, ref2, rtol=1e-5, atol=1e-5), (loss2, ref2)

    print("KERNEL_OK")
</pallas_src>

<mosaic_0001>
module attributes {stable_mosaic.version = 11 : i64} {
  func.func @_contrastive_loss_kernel(%arg0: i32, %arg1: i32, %arg2: memref<8x32xf32, #tpu.memory_space<vmem>>, %arg3: memref<8x32xf32, #tpu.memory_space<vmem>>, %arg4: memref<8x1xf32, #tpu.memory_space<vmem>>, %arg5: memref<8x128xf32, #tpu.memory_space<vmem>>, %arg6: memref<1x1xf32, #tpu.memory_space<vmem>>) attributes {dimension_semantics = [#tpu.dimension_semantics<parallel>, #tpu.dimension_semantics<arbitrary>], iteration_bounds = array<i64: 2, 1>, scalar_prefetch = 0 : i64, scratch_operands = 1 : i64, tpu.core_type = #tpu.core_type<tc>, window_params = [{transform_indices = @transform_0, window_bounds = array<i64: 8, 32>}, {transform_indices = @transform_1, window_bounds = array<i64: 8, 32>}, {transform_indices = @transform_2, window_bounds = array<i64: 8, 1>}, {transform_indices = @transform_3, window_bounds = array<i64: 8, 128>}]} {
    %c0_i32 = arith.constant 0 : i32
    %0 = arith.cmpi eq, %arg1, %c0_i32 : i32
    %1 = arith.extui %0 : i1 to i32
    %c0_i32_0 = arith.constant 0 : i32
    %2 = arith.cmpi ne, %1, %c0_i32_0 : i32
    scf.if %2 {
      %cst_19 = arith.constant 0.000000e+00 : f32
      %45 = vector.broadcast %cst_19 : f32 to vector<1x1xf32>
      %c0_20 = arith.constant 0 : index
      %c0_21 = arith.constant 0 : index
      %46 = vector.load %arg6[%c0_20, %c0_21] : memref<1x1xf32, #tpu.memory_space<vmem>>, vector<1x1xf32>
      tpu.vector_store %arg6[%c0_20, %c0_21], %45 {strides = array<i32>} : memref<1x1xf32, #tpu.memory_space<vmem>>, vector<1x1xf32>,
    } else {
    }
    %c0 = arith.constant 0 : index
    %c0_1 = arith.constant 0 : index
    %3 = vector.load %arg2[%c0, %c0_1] : memref<8x32xf32, #tpu.memory_space<vmem>>, vector<8x32xf32>
    %c0_2 = arith.constant 0 : index
    %c0_3 = arith.constant 0 : index
    %4 = vector.load %arg3[%c0_2, %c0_3] : memref<8x32xf32, #tpu.memory_space<vmem>>, vector<8x32xf32>
    %c0_4 = arith.constant 0 : index
    %c0_5 = arith.constant 0 : index
    %5 = vector.load %arg4[%c0_4, %c0_5] : memref<8x1xf32, #tpu.memory_space<vmem>>, vector<8x1xf32>
    %6 = arith.subf %3, %4 : vector<8x32xf32>
    %cst = arith.constant 9.99999997E-7 : f32
    %7 = vector.broadcast %cst : f32 to vector<8x32xf32>
    %8 = arith.addf %6, %7 : vector<8x32xf32>
    %9 = arith.mulf %8, %8 : vector<8x32xf32>
    %cst_6 = arith.constant dense<0.000000e+00> : vector<8xf32>
    %10 = vector.multi_reduction <add>, %9, %cst_6 [1] : vector<8x32xf32> to vector<8xf32>
    %11 = vector.shape_cast %10 : vector<8xf32> to vector<8x1xf32>
    %12 = math.sqrt %11 : vector<8x1xf32>
    %cst_7 = arith.constant 5.000000e+00 : f32
    %13 = vector.broadcast %cst_7 : f32 to vector<8x1xf32>
    %14 = arith.subf %13, %12 : vector<8x1xf32>
    %cst_8 = arith.constant 0.000000e+00 : f32
    %15 = vector.broadcast %cst_8 : f32 to vector<8x1xf32>
    %16 = arith.maximumf %14, %15 : vector<8x1xf32>
    %17 = arith.mulf %5, %11 : vector<8x1xf32>
    %cst_9 = arith.constant 1.000000e+00 : f32
    %18 = vector.broadcast %cst_9 : f32 to vector<8x1xf32>
    %19 = arith.subf %18, %5 : vector<8x1xf32>
    %20 = arith.mulf %16, %16 : vector<8x1xf32>
    %21 = arith.mulf %19, %20 : vector<8x1xf32>
    %22 = arith.addf %17, %21 : vector<8x1xf32>
    %c8_i32 = arith.constant 8 : i32
    %23 = arith.muli %arg0, %c8_i32 : i32
    %c8_i32_10 = arith.constant 8 : i32
    %24 = arith.muli %arg1, %c8_i32_10 : i32
    %25 = arith.addi %23, %24 : i32
    %26 = tpu.iota {dimensions = array<i32: 0>} : vector<8x1xi32>
    %27 = vector.broadcast %25 : i32 to vector<8x1xi32>
    %28 = arith.addi %27, %26 : vector<8x1xi32>
    %c8_i32_11 = arith.constant 8 : i32
    %29 = vector.broadcast %c8_i32_11 : i32 to vector<8x1xi32>
    %30 = arith.cmpi slt, %28, %29 : vector<8x1xi32>
    %31 = arith.extui %30 : vector<8x1xi1> to vector<8x1xi32>
    %32 = arith.sitofp %31 : vector<8x1xi32> to vector<8x1xf32>
    %c0_12 = arith.constant 0 : index
    %c0_13 = arith.constant 0 : index
    %33 = vector.load %arg6[%c0_12, %c0_13] : memref<1x1xf32, #tpu.memory_space<vmem>>, vector<1x1xf32>
    %34 = arith.mulf %22, %32 : vector<8x1xf32>
    %35 = vector.shape_cast %34 : vector<8x1xf32> to vector<1x8x1xf32>
    %cst_14 = arith.constant dense<0.000000e+00> : vector<1xf32>
    %36 = vector.multi_reduction <add>, %35, %cst_14 [1, 2] : vector<1x8x1xf32> to vector<1xf32>
    %37 = vector.shape_cast %36 : vector<1xf32> to vector<1x1x1xf32>
    %38 = vector.extract %37[0, 0, 0] : f32 from vector<1x1x1xf32>
    %39 = vector.broadcast %38 : f32 to vector<1x1xf32>
    %40 = arith.addf %33, %39 : vector<1x1xf32>
    %c0_15 = arith.constant 0 : index
    %c0_16 = arith.constant 0 : index
    %41 = vector.load %arg6[%c0_15, %c0_16] : memref<1x1xf32, #tpu.memory_space<vmem>>, vector<1x1xf32>
    tpu.vector_store %arg6[%c0_15, %c0_16], %40 {strides = array<i32>} : memref<1x1xf32, #tpu.memory_space<vmem>>, vector<1x1xf32>,
    %c0_i32_17 = arith.constant 0 : i32
    %42 = arith.cmpi eq, %arg1, %c0_i32_17 : i32
    %43 = arith.extui %42 : i1 to i32
    %c0_i32_18 = arith.constant 0 : i32
    %44 = arith.cmpi ne, %43, %c0_i32_18 : i32
    scf.if %44 {
      %45 = tpu.iota {dimensions = array<i32: 0>} : vector<8x128xi32>
      %46 = tpu.iota {dimensions = array<i32: 1>} : vector<8x128xi32>
      %c0_19 = arith.constant 0 : index
      %c0_20 = arith.constant 0 : index
      %47 = vector.load %arg6[%c0_19, %c0_20] : memref<1x1xf32, #tpu.memory_space<vmem>>, vector<1x1xf32>
      %c0_i32_21 = arith.constant 0 : i32
      %48 = vector.broadcast %c0_i32_21 : i32 to vector<8x128xi32>
      %49 = arith.cmpi eq, %45, %48 : vector<8x128xi32>
      %c0_i32_22 = arith.constant 0 : i32
      %50 = vector.broadcast %c0_i32_22 : i32 to vector<8x128xi32>
      %51 = arith.cmpi eq, %46, %50 : vector<8x128xi32>
      %52 = arith.andi %49, %51 : vector<8x128xi1>
      %cst_23 = arith.constant 0.000000e+00 : f32
      %53 = vector.broadcast %cst_23 : f32 to vector<1x1xf32>
      %54 = vector.shape_cast %47 : vector<1x1xf32> to vector<1x1xf32>
      %55 = vector.broadcast %54 : vector<1x1xf32> to vector<8x128xf32>
      %56 = vector.shape_cast %53 : vector<1x1xf32> to vector<1x1xf32>
      %57 = vector.broadcast %56 : vector<1x1xf32> to vector<8x128xf32>
      %58 = arith.select %52, %55, %57 : vector<8x128xi1>, vector<8x128xf32>
      %c0_24 = arith.constant 0 : index
      %c0_25 = arith.constant 0 : index
      %59 = vector.load %arg5[%c0_24, %c0_25] : memref<8x128xf32, #tpu.memory_space<vmem>>, vector<8x128xf32>
      tpu.vector_store %arg5[%c0_24, %c0_25], %58 {strides = array<i32>} : memref<8x128xf32, #tpu.memory_space<vmem>>, vector<8x128xf32>,
    } else {
    }
    return
  }
  func.func @transform_0(%arg0: i32, %arg1: i32) -> (i32, i32) {
    %c1_i32 = arith.constant 1 : i32
    %0 = arith.muli %arg0, %c1_i32 : i32
    %1 = arith.addi %0, %arg1 : i32
    %c0_i32 = arith.constant 0 : i32
    %c0_i32_0 = arith.constant 0 : i32
    return %1, %c0_i32 : i32, i32
  }
  func.func @transform_1(%arg0: i32, %arg1: i32) -> (i32, i32) {
    %c1_i32 = arith.constant 1 : i32
    %0 = arith.muli %arg0, %c1_i32 : i32
    %1 = arith.addi %0, %arg1 : i32
    %c0_i32 = arith.constant 0 : i32
    %c0_i32_0 = arith.constant 0 : i32
    return %1, %c0_i32 : i32, i32
  }
  func.func @transform_2(%arg0: i32, %arg1: i32) -> (i32, i32) {
    %c1_i32 = arith.constant 1 : i32
    %0 = arith.muli %arg0, %c1_i32 : i32
    %1 = arith.addi %0, %arg1 : i32
    %c0_i32 = arith.constant 0 : i32
    %c0_i32_0 = arith.constant 0 : i32
    return %1, %c0_i32 : i32, i32
  }
  func.func @transform_3(%arg0: i32, %arg1: i32) -> (i32, i32) {
    %c0_i32 = arith.constant 0 : i32
    %c0_i32_0 = arith.constant 0 : i32
    return %arg0, %c0_i32 : i32, i32
  }
}

</mosaic_0001>

<bundles_post_ra>
// kernel: tpu_custom_call.1
= control target key start
LH: loop header
LB: loop body
LE: loop exit
PB: predicated region body
PF: predicated region fallthrough
CT: control target
= control target key end

     0   :  { %8 = vsyncpa [#allocation4], 0  ;;  %s821_s0 = inlined_call_operand.vmem [shape: f32[16,32], index: 0, kind: input, shape index: {}]   ;;  %s822_s1 = inlined_call_operand.hbm [shape: f32[16,32], index: 1, kind: input, shape index: {}]   ;;  %s823_s2 = inlined_call_operand.vmem [shape: f32[16,1], index: 2, kind: input, shape index: {}]   ;;  %s824_s3 = inlined_call_operand.hbm [shape: f32[16,128], index: 3, kind: output, shape index: {}]  }
   0x1   :  { %10 = vsyncpa [#allocation4 + $0x1], 0 }
   0x2   :  { %11 = vsyncpa [#allocation5], 0 }
   0x3   :  { %13 = vsyncpa [#allocation5 + $0x1], 0  ;;  %s666_s12 = smov 0   ;;  %s668_s13 = smov 0  }
   0x4   :  { %s670_s14 = smov 0   ;;  %s672_s15 = smov 0  }
   0x5   :  { %s674_s16 = smov 0   ;;  %s676_s17 = smov 0  }
   0x6 LB: > { %s444_s18 = sadd.s32 4294967295, %s640_s17   ;;  %s445_s19 = sadd.s32 4294967294, %s640_s17   ;;  %s640_s17 = sphi %s676_s17, %s19_s17   ;;  %s636_s16 = sphi %s674_s16, %s836_s16   ;;  %s632_s15 = sphi %s672_s15, %s835_s15   ;;  %s628_s14 = sphi %s670_s14, %s834_s14   ;;  %s624_s13 = sphi %s668_s13, %s833_s13   ;;  %s620_s12 = sphi %s666_s12, %s832_s12  }
   0x7   : > { %s31_s20 = sadd.s32 1, %s636_s16  ;;  %s68_s21 = sadd.s32 1, %s628_s14 }
   0x8   : > { %p33_p0 = scmp.ge.s32.totalorder %s31_s20, 2  ;;  %p75_p1 = scmp.ne.s32.totalorder %s628_s14, %s624_s13 }
   0x9   : > { %p76_p2 = scmp.eq.s32.totalorder %s640_s17, 0  ;;  %p81_p3 = scmp.ne.s32.totalorder %s624_s13, %s620_s12 }
   0xa   : > { %s838_s20 = smov (%p33_p0, %s31_s20), 0  ;;  %p82_p5 = scmp.eq.s32.totalorder %s444_s18, 0 }
   0xb   : > { %p707_p4 = por %p76_p2, %p75_p1  ;;  %s65_s23 = ssub.s32 %s636_s16, %s838_s20 }
   0xc   : > { %p133_p6 = scmp.eq.s32.totalorder %s444_s18, 1  ;;  %p66_p7 = scmp.eq.s32.totalorder %s65_s23, 0 }
   0xd   : > { %p713_p8 = por %p82_p5, %p81_p3  ;;  %p139_p10 = scmp.eq.s32.totalorder %s445_s19, 1 }
   0xe   : > { %p717_p9 = por %p133_p6, %p75_p1  ;;  %p476_p13 = scmp.lt.s32.totalorder %s640_s17, 2 }
   0xf   : > { %s722_s26 = scalar_select %p66_p7, %s628_s14, %s68_s21  }
  0x10   : > { %p724_p11 = por %p139_p10, %p81_p3  ;;  %s168_s28 = sand.u32 1, %s628_s14  }
  0x11   : > { %s448_s29 = sshll.u32 %s168_s28, 3  ;;  %s449_s30 = sshll.u32 %s636_s16, 7 }
  0x12   : > { %s828_s27 = scalar_select %p724_p11, 1, 0 }
  0x13   : > { %s178_s6 = scalar_lea.hbm %s822_s1, %s449_s30  ;;  %s172_s7 = scalar_lea.vmem [#allocation3], %s448_s29 }
  0x14   : > { %s180_s8 = sshll.u32 %s172_s7, 4  ;;  %p737_p0 = pnand %p476_p13, %p707_p4  ;;  %s181_s8 = int_to_ptr.vmem [resolvable:$true] %s180_s8 }
  0x15   : > { %p450_p1 = scmp.ge.s32.totalorder %s640_s17, 1  ;;  %p194_p2 = scmp.lt.s32.totalorder %s640_s17, 3 }
  0x16   : > { %s169_s10 = scalar_lea.sflag [#allocation4], %s168_s28  ;;  %p534_p3 = pneg %p737_p0 }
  0x17   : > { %s545_s11 = scalar_lea.vmem %s181_s8, 128  ;;  %s642_s18 = smov [#allocation3]  }
  0x18   : > { %p546_p5 = scmp.ne.s32.totalorder %s181_s8, %s545_s11  ;;  %s550_s19 = sshll.u32 %s642_s18, 4  ;;  %s551_s19 = int_to_ptr.vmem [resolvable:$false] %s550_s19 }
  0x19   : > { %s552_s21 = scalar_lea.vmem %s551_s19, 256  ;;  %p553_p10 = scmp.lt.s32.totalorder %s181_s8, %s551_s19 }
  0x1a   : > { %p548_p6 = pnand %p546_p5, %p534_p3  ;;  %p554_p12 = scmp.lt.s32.totalorder %s552_s21, %s545_s11 }
  0x1c   : > { %p549_p7 = pneg %p548_p6  ;;  %p555_p4 = por %p554_p12, %p553_p10 }
  0x1e   : > { %p556_p13 = pnand %p555_p4, %p549_p7 }
  0x20   : > { %559 = shalt.err (!%p556_p13)
}
  0x21   : > { %471 = dma.hbm_to_vmem [thread:$0]  (!%p737_p0), %s178_s6, 128, %s181_s8, %s169_s10  }
  0x22   : > { %p195_p11 = pnand %p450_p1, %p194_p2 }
  0x23   : > { %s752_s22 = sand.u32 (!%p195_p11), 1, %s624_s13  }
  0x24   : > { %198 = sbr.rel (%p195_p11) target bundleno = 574 (0x23e), region = 32  ;;  %s451_s23 = sshll.u32 (!%p195_p11), %s752_s22, 3 }
  0x25   : > { %s201_s28 = scalar_lea.sflag (!%p195_p11), [#allocation4], %s752_s22  ;;  %s204_s29 = scalar_lea.vmem (!%p195_p11), [#allocation3], %s451_s23 }
  0x29   : > { %611 = dma.done.wait (%p713_p8), %s201_s28, 128  }
  0x2a   : > { %613 = vsyncadd (%p713_p8), %s201_s28, 4294967168  ;;  %p238_p12 = scmp.lt.s32.totalorder %s632_s15, 1  ;;  %v257_v1 = vld [vmem:[%s204_s29] sm:$0xff]  ;;  %vm262_vm0 = vcmask 261120   ;;  %vm254_vm1 = vcmask 0   ;;  %v643_v6 = vmov 0.0   ;;  %v283_v8 = vlaneseq }
  0x2b   : > { %255 = vst.msk [vmem:[#allocation2] sm:$0x1] %vm254_vm1, %v643_v6  ;;  %s455_s24 = sshll.u32 %s632_s15, 3  ;;  %vm292_vm5 = vcmask 7168   ;;  %v644_v28 = vmov 0   ;;  %s459_s18 = sshll.u32 %s632_s15, 7 }
  0x2c   : > { %s239_s30 = scalar_select %p238_p12, %s632_s15, 1  ;;  %v284_v11 = vshrl.u32 %v283_v8, 7  ;;  %v285_v13 = vstv %s455_s24  ;;  %528 = vset.pattern.permute.xlu1 %v644_v28  ;;  %529 = vset.pattern.permute.xlu0 %v644_v28  ;;  %v311_v40 = vand.u32 127, %v283_v8 }
  0x2d   : > { %s236_s19 = scalar_lea.vmem [#allocation6], %s451_s23  ;;  %s645_s15 = smov [#allocation6]  }
  0x2e   : > { %s453_s4 = sshll.u32 %s239_s30, 3  ;;  %v286_v17 = vadd.s32 %v285_v13, %v284_v11  ;;  %vm313_vm6 = vcmp.eq.s32.totalorder %v284_v11, 0  ;;  %vm314_vm7 = vcmp.eq.s32.totalorder %v311_v40, 0  ;;  %s341_s21 = sshll.u32 %s236_s19, 4  ;;  %s342_s21 = int_to_ptr.vmem [resolvable:$true] %s341_s21 }
  0x2f   : > { %s241_s7 = scalar_lea.vmem %s821_s0, %s453_s4  ;;  %s248_s10 = scalar_lea.vmem %s823_s2, %s453_s4  ;;  %vm315_vm8 = vmand %vm313_vm6, %vm314_vm7 }
  0x30   : > { %v256_v0 = vld [vmem:[%s241_s7] sm:$0xff]  ;;  %vm287_vm4 = vcmp.lt.s32.totalorder %v286_v17, 8  ;;  %s779_s30 = scalar_lea.hbm %s824_s3, %s459_s18  ;;  %s328_s4 = scalar_lea.sflag [#allocation5], %s752_s22 }
  0x31   : > { %v259_v2 = vsub.f32 %v256_v0, %v257_v1  ;;  %v258_v18 = vld [vmem:[%s248_s10] sm:$0xff]  ;;  %v456_v24 = vsel %vm287_vm4, 1.0, %v643_v6  ;;  %s560_s5 = scalar_lea.vmem %s342_s21, 128  ;;  %s564_s6 = sshll.u32 %s645_s15, 4  ;;  %s565_s6 = int_to_ptr.vmem [resolvable:$false] %s564_s6 }
  0x32   : > { %v276_v20 = vsub.f32 1.0, %v258_v18  ;;  %v290_v36 = vld [vmem:[#allocation2] sm:$0x1]  ;;  %p561_p8 = scmp.ne.s32.totalorder %s342_s21, %s560_s5  ;;  %s566_s23 = scalar_lea.vmem %s565_s6, 256 }
  0x33   : > { %v260_v3 = vadd.f32 1e-06, %v259_v2  ;;  %p567_p1 = scmp.lt.s32.totalorder %s342_s21, %s565_s6  ;;  %p568_p2 = scmp.lt.s32.totalorder %s566_s23, %s560_s5 }
  0x34   : > { %p562_p11 = pnand %p561_p8, %p717_p9 }
  0x35   : > { %v261_v4 = vmul.f32 %v260_v3, %v260_v3  ;;  %p569_p3 = por %p568_p2, %p567_p1 }
  0x36   : > { %p563_p0 = pneg %p562_p11 }
  0x37   : > { %v263_v5 = vsel %vm262_vm0, %v261_v4, 0.0 }
  0x38   : > { %264 = vadd.xlane.f32.xlu0 %v263_v5  ;;  %p570_p5 = pnand %p569_p3, %p563_p0 }
  0xc1   : > { %v265_v7 = vpop.xlane.xlu0 %264 }
  0xc2   : > { %530 = vrsqrt.f32 %v265_v7  ;;  %vm268_vm2 = vcmp.eq.f32.partialorder %v265_v7, inf  ;;  %v271_v12 = vand.u32 2147483648, %v265_v7  ;;  %vm270_vm3 = vcmp.eq.f32.partialorder %v265_v7, 0.0 }
  0xc3   : > { %v275_v22 = vmul.f32 %v265_v7, %v258_v18 }
  0xcf   : > { %v531_v9 = vpop.eup %530 }
  0xd0   : > { %v267_v10 = vmul.f32 %v531_v9, %v265_v7 }
  0xd2   : > { %v269_v14 = vsel %vm268_vm2, %v265_v7, %v267_v10 }
  0xd3   : > { %v272_v15 = vsel %vm270_vm3, %v271_v12, %v269_v14 }
  0xd4   : > { %v273_v16 = vsub.f32 5.0, %v272_v15 }
  0xd6   : > { %v274_v19 = vmax.f32 %v273_v16, 0.0 }
  0xd8   : > { %v277_v21 = vmul.f32 %v274_v19, %v274_v19 }
  0xda   : > { %v278_v23 = vmul.f32 %v277_v21, %v276_v20 }
  0xdc   : > { %v279_v25 = vadd.f32 %v278_v23, %v275_v22 }
  0xde   : > { %v291_v26 = vmul.f32 %v456_v24, %v279_v25 }
  0xe0   : > { %v293_v27 = vsel %vm292_vm5, %v291_v26, 0.0 }
  0xe1   : > { %294 = vadd.xlane.f32.xlu0 %v293_v27 }
 0x16a   : > { %v295_v29 = vpop.xlane.xlu0 %294 }
 0x16b   : > { %v296_v30 = vrot.slane %v295_v29, 4 }
 0x16d   : > { %v297_v31 = vadd.f32 %v296_v30, %v295_v29 }
 0x16f   : > { %v298_v32 = vrot.slane %v297_v31, 2 }
 0x171   : > { %v299_v33 = vadd.f32 %v298_v32, %v297_v31 }
 0x173   : > { %v300_v34 = vrot.slane %v299_v33, 1 }
 0x175   : > { %v301_v35 = vadd.f32 %v300_v34, %v299_v33 }
 0x177   : > { %462 = vpush %v301_v35 }
 0x1a8   : > { %s463_s11 = spop %462 }
 0x1a9   : > { %v303_v37 = vstv %s463_s11 }
 0x1aa   : > { %v304_v38 = vadd.f32 %v303_v37, %v290_v36 }
 0x1ac   : > { %306 = vst.msk [vmem:[#allocation2] sm:$0x1] %vm254_vm1, %v304_v38 }
 0x1b3   : > { %v457_v39 = vld [vmem:[#allocation2] ss:$0 sm:$0xff] }
 0x1b4   : > { %322 = vperm.xlu1 %528, %v457_v39  }
 0x22f   : > { %v323_v41 = vpop.permute.xlu1 %322 }
 0x230   : > { %v325_v42 = vsel %vm315_vm8, %v323_v41, 0.0 }
 0x231   : > { %326 = vst [vmem:[%s236_s19] sm:$0xff] %v325_v42 }
 0x232   : > { %573 = shalt.err (!%p570_p5)
}
 0x233   : > { %s574_s7 = scalar_lea.hbm %s779_s30, 128  ;;  %s578_s8 = scalar_lea.hbm %s824_s3, 256 }
 0x234   : > { %p575_p6 = scmp.ne.s32.totalorder %s779_s30, %s574_s7  ;;  %p579_p4 = scmp.lt.s32.totalorder %s779_s30, %s824_s3 }
 0x235   : > { %p580_p13 = scmp.lt.s32.totalorder %s578_s8, %s574_s7 }
 0x236   : > { %p576_p7 = pnand %p575_p6, %p717_p9 }
 0x237   : > { %p581_p12 = por %p580_p13, %p579_p4 }
 0x238   : > { %p577_p10 = pneg %p576_p7 }
 0x23a   : > { %p582_p8 = pnand %p581_p12, %p577_p10 }
 0x23c   : > { %585 = shalt.err (!%p582_p8)
}
 0x23d   : > { %466 = dma.vmem_to_hbm [thread:$0]  (%p717_p9), %s342_s21, 128, %s779_s30, %s328_s4  }
 0x23e PF: > { %s353_s11 = sand.u32 1, %s620_s12   ;;  %p830_p11 = scmp.ne.s32.totalorder %s828_s27, 0 }
 0x23f   : > { %p831_p0 = scmp.ge.s32.totalorder %s640_s17, 2  ;;  %s354_s18 = scalar_lea.sflag [#allocation5], %s353_s11 }
 0x241   : > { %p473_p1 = pnand %p831_p0, %p830_p11 }
 0x243   : > { %p474_p2 = pneg %p473_p1 }
 0x245   : > { %615 = dma.done.wait (%p474_p2), %s354_s18, 128  }
 0x246   : > { %617 = vsyncadd (%p474_p2), %s354_s18, 4294967168  ;;  %s19_s17 = sadd.s32 1, %s640_s17   ;;  %s832_s12 = smov %s624_s13 }
 0x247   : > { %p16_p3 = scmp.ge.s32.totalorder %s19_s17, 4   ;;  %s833_s13 = smov %s628_s14 }
 0x248   : > { %s834_s14 = smov %s722_s26  ;;  %s835_s15 = smov %s636_s16 }
 0x249   : > { %s836_s16 = smov %s838_s20  ;;  %18 = sbr.rel (!%p16_p3) target bundleno = 6 (0x6), region = 91 }
 0x24e   :  { %359 = vsyncpa [#allocation4], 1 }
 0x24f   :  { %361 = vsyncpa [#allocation4 + $0x1], 1 }
 0x250   :  { %362 = vsyncpa [#allocation5], 1 }
 0x251   :  { %364 = vsyncpa [#allocation5 + $0x1], 1 }

</bundles_post_ra>
